<compile_context>
chip_gen: v5e
topology: v5e:2x2
jax: 0.10.0
libtpu: 0.0.40
codegen_flags: <defaults>
</compile_context>

<pallas_src>
import functools

import jax
import jax.numpy as jnp
from jax.experimental import pallas as pl
from jax.experimental.pallas import tpu as pltpu


def _round_up(x: int, m: int) -> int:
    return ((x + m - 1) // m) * m


# ---------------------------------------------------------------------------
# Kernel: one batch tile of the fused MLP  (fc1 -> ReLU -> fc2 -> sigmoid)
# ---------------------------------------------------------------------------
def generator_kernel(z_ref, w1_ref, b1_ref, w2_ref, b2_ref, out_ref):
    # fc1: (TB, Kp)bf16 @ (Kp, H)bf16 -> f32 accum
    h = jnp.dot(z_ref[...], w1_ref[...], preferred_element_type=jnp.float32)
    h = jnp.maximum(h + b1_ref[...], 0.0)                      # bias + ReLU in f32
    # fc2: (TB, H)bf16 @ (H, Np)bf16 -> f32 accum
    o = jnp.dot(h.astype(w2_ref.dtype), w2_ref[...],
                preferred_element_type=jnp.float32)
    o = o + b2_ref[...]
    out_ref[...] = jax.nn.sigmoid(o).astype(out_ref.dtype)     # f32 epilogue


# ---------------------------------------------------------------------------
# One-time parameter preparation (hoisted out of the per-call path)
# ---------------------------------------------------------------------------
def prepare_generator_params(w1, b1, w2, b2):
    """w1: (in_dim, hid), b1: (hid,), w2: (hid, out_dim), b2: (out_dim,)."""
    in_dim, hid = w1.shape
    out_dim = w2.shape[1]
    k_pad = _round_up(in_dim, 128)     # 100 -> 128
    n_pad = _round_up(out_dim, 128)    # 784 -> 896

    w1_p = jnp.zeros((k_pad, hid), jnp.bfloat16)
    w1_p = w1_p.at[:in_dim, :].set(w1.astype(jnp.bfloat16))
    w2_p = jnp.zeros((hid, n_pad), jnp.bfloat16)
    w2_p = w2_p.at[:, :out_dim].set(w2.astype(jnp.bfloat16))
    b1_p = b1.reshape(1, hid).astype(jnp.float32)
    b2_p = jnp.zeros((1, n_pad), jnp.float32)
    b2_p = b2_p.at[0, :out_dim].set(b2.astype(jnp.float32))
    return w1_p, b1_p, w2_p, b2_p


# ---------------------------------------------------------------------------
# Forward wrapper
# ---------------------------------------------------------------------------
@functools.partial(jax.jit, static_argnames=("out_dim",))
def generator_forward(z, w1_p, b1_p, w2_p, b2_p, *, out_dim):
    """z: (B, ...) flattened to (B, input_dim); returns (B, out_dim) f32."""
    B = z.shape[0]
    z2d = z.reshape(B, -1)
    in_dim = z2d.shape[1]
    k_pad, hid = w1_p.shape
    n_pad = w2_p.shape[1]

    # Batch tiling: pad B up to a multiple of the batch tile (min 8 sublanes).
    tb = min(512, _round_up(B, 8))
    b_pad = _round_up(B, tb)
    n_blocks = b_pad // tb

    # Zero-pad z in both batch and K; padded K columns are zero so fc1 is exact.
    z_p = jnp.zeros((b_pad, k_pad), jnp.bfloat16)
    z_p = z_p.at[:B, :in_dim].set(z2d.astype(jnp.bfloat16))

    out_p = pl.pallas_call(
        generator_kernel,
        out_shape=jax.ShapeDtypeStruct((b_pad, n_pad), jnp.float32),
        grid=(n_blocks,),
        in_specs=[
            pl.BlockSpec((tb, k_pad), lambda i: (i, 0)),   # z: tiled over batch
            pl.BlockSpec((k_pad, hid), lambda i: (0, 0)),  # W1: VMEM-resident
            pl.BlockSpec((1, hid), lambda i: (0, 0)),      # b1
            pl.BlockSpec((hid, n_pad), lambda i: (0, 0)),  # W2: VMEM-resident
            pl.BlockSpec((1, n_pad), lambda i: (0, 0)),    # b2
        ],
        out_specs=pl.BlockSpec((tb, n_pad), lambda i: (i, 0)),
        compiler_params=pltpu.CompilerParams(
            dimension_semantics=("parallel",)),            # megacore over batch
    )(z_p, w1_p, b1_p, w2_p, b2_p)

    return out_p[:B, :out_dim]


# ---------------------------------------------------------------------------
# Pure-JAX f32 reference (matches the PyTorch forward semantics)
# ---------------------------------------------------------------------------
def reference_forward(z, w1, b1, w2, b2):
    z2d = z.reshape(z.shape[0], -1).astype(jnp.float32)
    h = jnp.maximum(z2d @ w1 + b1, 0.0)
    return jax.nn.sigmoid(h @ w2 + b2)


if __name__ == "__main__":
    INPUT_DIM = 100
    HIDDEN = 128
    OUTPUT_DIM = 784
    B = 2

    key = jax.random.PRNGKey(0)
    k_z, k_w1, k_b1, k_w2, k_b2 = jax.random.split(key, 5)

    # Deterministic parameter init matching Generator.weights_init, which calls
    # normal_(mu, sig ** 2) with sig=0.075, i.e. std = 0.075**2 = 0.005625.
    std = 0.075 ** 2
    w1 = std * jax.random.normal(k_w1, (INPUT_DIM, HIDDEN), jnp.float32)
    b1 = std * jax.random.normal(k_b1, (HIDDEN,), jnp.float32)
    w2 = std * jax.random.normal(k_w2, (HIDDEN, OUTPUT_DIM), jnp.float32)
    b2 = std * jax.random.normal(k_b2, (OUTPUT_DIM,), jnp.float32)

    # Latent input; forward flattens to (B, input_dim).
    z = jax.random.normal(k_z, (B, INPUT_DIM), jnp.float32)

    # One-time parameter layout/cast (bf16, padded) — hoisted out of the call path.
    w1_p, b1_p, w2_p, b2_p = prepare_generator_params(w1, b1, w2, b2)

    out = generator_forward(z, w1_p, b1_p, w2_p, b2_p, out_dim=OUTPUT_DIM)
    out = jax.block_until_ready(out)

    ref = reference_forward(z, w1, b1, w2, b2)
    assert out.shape == (B, OUTPUT_DIM), out.shape
    # bf16 matmul operands with f32 accumulation: tiny deviation from the f32 ref.
    assert jnp.allclose(out, ref, atol=2e-3, rtol=0.0), "mismatch vs reference"

    print("KERNEL_OK")
</pallas_src>

<mosaic_0001>
module attributes {stable_mosaic.version = 11 : i64} {
  func.func @generator_kernel(%arg0: i32, %arg1: memref<8x128xbf16, #tpu.memory_space<vmem>>, %arg2: memref<128x128xbf16, #tpu.memory_space<vmem>>, %arg3: memref<1x128xf32, #tpu.memory_space<vmem>>, %arg4: memref<128x896xbf16, #tpu.memory_space<vmem>>, %arg5: memref<1x896xf32, #tpu.memory_space<vmem>>, %arg6: memref<8x896xf32, #tpu.memory_space<vmem>>) attributes {dimension_semantics = [#tpu.dimension_semantics<parallel>], iteration_bounds = array<i64: 1>, scalar_prefetch = 0 : i64, scratch_operands = 0 : i64, tpu.core_type = #tpu.core_type<tc>, window_params = [{transform_indices = @transform_0, window_bounds = array<i64: 8, 128>}, {pipeline_mode = #tpu.pipeline_mode<synchronous>, transform_indices = @transform_1, window_bounds = array<i64: 128, 128>}, {pipeline_mode = #tpu.pipeline_mode<synchronous>, transform_indices = @transform_2, window_bounds = array<i64: 1, 128>}, {pipeline_mode = #tpu.pipeline_mode<synchronous>, transform_indices = @transform_3, window_bounds = array<i64: 128, 896>}, {pipeline_mode = #tpu.pipeline_mode<synchronous>, transform_indices = @transform_4, window_bounds = array<i64: 1, 896>}, {transform_indices = @transform_5, window_bounds = array<i64: 8, 896>}]} {
    %c0 = arith.constant 0 : index
    %c0_0 = arith.constant 0 : index
    %0 = vector.load %arg1[%c0, %c0_0] : memref<8x128xbf16, #tpu.memory_space<vmem>>, vector<8x128xbf16>
    %c0_1 = arith.constant 0 : index
    %c0_2 = arith.constant 0 : index
    %1 = vector.load %arg2[%c0_1, %c0_2] : memref<128x128xbf16, #tpu.memory_space<vmem>>, vector<128x128xbf16>
    %cst = arith.constant dense<0.000000e+00> : vector<8x128xf32>
    %2 = tpu.matmul %0, %1, %cst {dimension_numbers = #tpu.dot_dimension_numbers<[1], [0], [0], [1], [0, 0, 1, 1], [], []>} : vector<8x128xbf16>, vector<128x128xbf16>, vector<8x128xf32> -> vector<8x128xf32>
    %c0_3 = arith.constant 0 : index
    %c0_4 = arith.constant 0 : index
    %3 = vector.load %arg3[%c0_3, %c0_4] : memref<1x128xf32, #tpu.memory_space<vmem>>, vector<1x128xf32>
    %4 = vector.broadcast %3 : vector<1x128xf32> to vector<8x128xf32>
    %5 = arith.addf %2, %4 : vector<8x128xf32>
    %cst_5 = arith.constant 0.000000e+00 : f32
    %6 = vector.broadcast %cst_5 : f32 to vector<8x128xf32>
    %7 = arith.maximumf %5, %6 : vector<8x128xf32>
    %8 = arith.truncf %7 : vector<8x128xf32> to vector<8x128xbf16>
    %c0_6 = arith.constant 0 : index
    %c0_7 = arith.constant 0 : index
    %9 = vector.load %arg4[%c0_6, %c0_7] : memref<128x896xbf16, #tpu.memory_space<vmem>>, vector<128x896xbf16>
    %cst_8 = arith.constant dense<0.000000e+00> : vector<8x896xf32>
    %10 = tpu.matmul %8, %9, %cst_8 {dimension_numbers = #tpu.dot_dimension_numbers<[1], [0], [0], [1], [0, 0, 1, 1], [], []>} : vector<8x128xbf16>, vector<128x896xbf16>, vector<8x896xf32> -> vector<8x896xf32>
    %c0_9 = arith.constant 0 : index
    %c0_10 = arith.constant 0 : index
    %11 = vector.load %arg5[%c0_9, %c0_10] : memref<1x896xf32, #tpu.memory_space<vmem>>, vector<1x896xf32>
    %12 = vector.broadcast %11 : vector<1x896xf32> to vector<8x896xf32>
    %13 = arith.addf %10, %12 : vector<8x896xf32>
    %14 = arith.negf %13 : vector<8x896xf32>
    %15 = math.exp %14 : vector<8x896xf32>
    %cst_11 = arith.constant 1.000000e+00 : f32
    %16 = vector.broadcast %cst_11 : f32 to vector<8x896xf32>
    %17 = arith.addf %16, %15 : vector<8x896xf32>
    %18 = arith.divf %16, %17 : vector<8x896xf32>
    %c0_12 = arith.constant 0 : index
    %c0_13 = arith.constant 0 : index
    %19 = vector.load %arg6[%c0_12, %c0_13] : memref<8x896xf32, #tpu.memory_space<vmem>>, vector<8x896xf32>
    tpu.vector_store %arg6[%c0_12, %c0_13], %18 {strides = array<i32>} : memref<8x896xf32, #tpu.memory_space<vmem>>, vector<8x896xf32>,
    return
  }
  func.func @transform_0(%arg0: i32) -> (i32, i32) {
    %c0_i32 = arith.constant 0 : i32
    %c0_i32_0 = arith.constant 0 : i32
    return %arg0, %c0_i32 : i32, i32
  }
  func.func @transform_1(%arg0: i32) -> (i32, i32) {
    %c0_i32 = arith.constant 0 : i32
    %c0_i32_0 = arith.constant 0 : i32
    %c0_i32_1 = arith.constant 0 : i32
    return %c0_i32, %c0_i32_0 : i32, i32
  }
  func.func @transform_2(%arg0: i32) -> (i32, i32) {
    %c0_i32 = arith.constant 0 : i32
    %c0_i32_0 = arith.constant 0 : i32
    %c0_i32_1 = arith.constant 0 : i32
    return %c0_i32, %c0_i32_0 : i32, i32
  }
  func.func @transform_3(%arg0: i32) -> (i32, i32) {
    %c0_i32 = arith.constant 0 : i32
    %c0_i32_0 = arith.constant 0 : i32
    %c0_i32_1 = arith.constant 0 : i32
    return %c0_i32, %c0_i32_0 : i32, i32
  }
  func.func @transform_4(%arg0: i32) -> (i32, i32) {
    %c0_i32 = arith.constant 0 : i32
    %c0_i32_0 = arith.constant 0 : i32
    %c0_i32_1 = arith.constant 0 : i32
    return %c0_i32, %c0_i32_0 : i32, i32
  }
  func.func @transform_5(%arg0: i32) -> (i32, i32) {
    %c0_i32 = arith.constant 0 : i32
    %c0_i32_0 = arith.constant 0 : i32
    return %arg0, %c0_i32 : i32, i32
  }
}

</mosaic_0001>

<bundles_post_ra>
// kernel: generator_forward.1
= control target key start
LH: loop header
LB: loop body
LE: loop exit
PB: predicated region body
PF: predicated region fallthrough
CT: control target
= control target key end

     0   :  { %10 = vsyncpa [#allocation3], 0  ;;  %s1256_s0 = inlined_call_operand.vmem [shape: bf16[8,128], index: 0, kind: input, shape index: {}]   ;;  %s1257_s1 = inlined_call_operand.hbm [shape: bf16[128,128], index: 1, kind: input, shape index: {}]   ;;  %s1258_s2 = inlined_call_operand.vmem [shape: f32[1,128], index: 2, kind: input, shape index: {}]   ;;  %s1259_s3 = inlined_call_operand.hbm [shape: bf16[128,896], index: 3, kind: input, shape index: {}]   ;;  %s1260_s4 = inlined_call_operand.vmem [shape: f32[1,896], index: 4, kind: input, shape index: {}]   ;;  %s1261_s5 = inlined_call_operand.vmem [shape: f32[8,896], index: 5, kind: output, shape index: {}]  }
   0x1   :  { %s18_s20 = sshll.u32 %s1257_s1, 4  ;;  %s19_s20 = int_to_ptr.hbm [resolvable:$true] %s18_s20 }
   0x2   :  { %11 = vsyncpa [#allocation5], 0  ;;  %s1155_s21 = smov [#allocation2]   ;;  %s33_s25 = sshll.u32 %s1259_s3, 4  ;;  %s34_s25 = int_to_ptr.hbm [resolvable:$true] %s33_s25 }
   0x3   :  { %s20_s22 = sshll.u32 %s1155_s21, 4  ;;  %s1156_s26 = smov 64   ;;  %s21_s22 = int_to_ptr.vmem [resolvable:$true] %s20_s22 }
   0x4   :  { %s1157_s27 = smov 4   ;;  %s1158_s28 = smov [#allocation4]  }
   0x5   :  { %26 = dma.hbm_to_vmem [thread:$0]  %s19_s20, 1024, %s21_s22, [#allocation3], %s1156_s26, %s1156_s26, %s1157_s27  }
   0x6   :  { %s35_s29 = sshll.u32 %s1158_s28, 4  ;;  %s1159_s30 = smov 448   ;;  %s36_s29 = int_to_ptr.vmem [resolvable:$true] %s35_s29 }
   0x7   :  { %s1160_s6 = smov 28  }
   0x8   :  { %41 = dma.hbm_to_vmem [thread:$0]  %s34_s25, 7168, %s36_s29, [#allocation5], %s1159_s30, %s1159_s30, %s1160_s6  }
   0x9   :  { %1151 = dma.done.wait [#allocation3], 1024  }
   0xa   :  { %1152 = vsyncadd [#allocation3], 4294966272 }
   0xb   :  { %1153 = dma.done.wait [#allocation5], 7168  }
   0xc   :  { %1154 = vsyncadd [#allocation5], 4294960128  ;;  %v1011_v0 = vld [vmem:[#allocation2 + $0x38] sm:$0xff]  ;;  %v1010_v1 = vld [vmem:[#allocation2 + $0x30] sm:$0xff] }
   0xd   :  { %121 = vmatpush.bf16.msra.mxu0 %v1011_v0  ;;  %v971_v2 = vld [vmem:[#allocation4 + $0x188] sm:$0xf]  ;;  %v1064_v3 = vld [vmem:[#allocation4 + $0x1a0] sm:$0xf0]  ;;  %v1061_v4 = vld [vmem:[#allocation4 + $0x18c] sm:$0xf] }
   0xe   :  { %v1009_v5 = vld [vmem:[#allocation2 + $0x28] sm:$0xff]  ;;  %v972_v6 = vor.u32 %v1064_v3, %v971_v2  ;;  %v979_v8 = vld [vmem:[#allocation4 + $0x190] sm:$0xf]  ;;  %v1054_v14 = vld [vmem:[#allocation4 + $0x154] sm:$0xf] }
   0xf   :  { %v973_v7 = vld [vmem:[#allocation4 + $0x1a4] sm:$0xf0]  ;;  %v1065_v9 = vld [vmem:[#allocation4 + $0x1a8] sm:$0xf0]  ;;  %v943_v12 = vld [vmem:[#allocation4 + $0x150] sm:$0xf] }
  0x10   :  { %v976_v10 = vor.u32 %v1061_v4, %v973_v7  ;;  %v980_v11 = vor.u32 %v1065_v9, %v979_v8  ;;  %v1057_v13 = vld [vmem:[#allocation4 + $0x168] sm:$0xf0]  ;;  %504 = vmatpush.bf16.msra.mxu1 %v972_v6  ;;  %v945_v16 = vld [vmem:[#allocation4 + $0x16c] sm:$0xf0]  ;;  %v951_v17 = vld [vmem:[#allocation4 + $0x158] sm:$0xf] }
  0x11   :  { %122 = vmatpush.bf16.msra.mxu0 %v1010_v1  ;;  %v944_v15 = vor.u32 %v1057_v13, %v943_v12  ;;  %v1058_v18 = vld [vmem:[#allocation4 + $0x170] sm:$0xf0]  ;;  %v948_v19 = vor.u32 %v1054_v14, %v945_v16  ;;  %v915_v21 = vld [vmem:[#allocation4 + $0x118] sm:$0xf]  ;;  %v1047_v23 = vld [vmem:[#allocation4 + $0x11c] sm:$0xf] }
  0x12   :  { %517 = vmatpush.bf16.msra.mxu2 %v976_v10  ;;  %530 = vmatpush.bf16.msra.mxu3 %v980_v11  ;;  %v952_v20 = vor.u32 %v1058_v18, %v951_v17  ;;  %v1050_v22 = vld [vmem:[#allocation4 + $0x130] sm:$0xf0]  ;;  %v917_v24 = vld [vmem:[#allocation4 + $0x134] sm:$0xf0]  ;;  %v923_v25 = vld [vmem:[#allocation4 + $0x120] sm:$0xf] }
  0x13   :  { %v1051_v26 = vld [vmem:[#allocation4 + $0x138] sm:$0xf0]  ;;  %v1008_v27 = vld [vmem:[#allocation2 + $0x20] sm:$0xff]  ;;  %v916_v28 = vor.u32 %v1050_v22, %v915_v21  ;;  %v920_v29 = vor.u32 %v1047_v23, %v917_v24  ;;  %v895_v35 = vld [vmem:[#allocation4 + $0xe8] sm:$0xf] }
  0x14   :  { %505 = vmatpush.bf16.msra.mxu1 %v944_v15  ;;  %v924_v30 = vor.u32 %v1051_v26, %v923_v25  ;;  %v887_v31 = vld [vmem:[#allocation4 + $0xe0] sm:$0xf]  ;;  %v1043_v32 = vld [vmem:[#allocation4 + $0xf8] sm:$0xf0]  ;;  %v1040_v33 = vld [vmem:[#allocation4 + $0xe4] sm:$0xf] }
  0x15   :  { %123 = vmatpush.bf16.msra.mxu0 %v1009_v5  ;;  %v889_v34 = vld [vmem:[#allocation4 + $0xfc] sm:$0xf0]  ;;  %v1044_v36 = vld [vmem:[#allocation4 + $0x100] sm:$0xf0]  ;;  %v1007_v37 = vld [vmem:[#allocation2 + $0x18] sm:$0xff]  ;;  %v888_v38 = vor.u32 %v1043_v32, %v887_v31 }
  0x16   :  { %518 = vmatpush.bf16.msra.mxu2 %v948_v19  ;;  %531 = vmatpush.bf16.msra.mxu3 %v952_v20  ;;  %v892_v39 = vor.u32 %v1040_v33, %v889_v34  ;;  %v896_v40 = vor.u32 %v1044_v36, %v895_v35  ;;  %v859_v41 = vld [vmem:[#allocation4 + $0xa8] sm:$0xf]  ;;  %v1036_v42 = vld [vmem:[#allocation4 + $0xc0] sm:$0xf0]  ;;  %v1033_v43 = vld [vmem:[#allocation4 + $0xac] sm:$0xf] }
  0x17   :  { %v861_v44 = vld [vmem:[#allocation4 + $0xc4] sm:$0xf0]  ;;  %v867_v45 = vld [vmem:[#allocation4 + $0xb0] sm:$0xf]  ;;  %v1037_v46 = vld [vmem:[#allocation4 + $0xc8] sm:$0xf0]  ;;  %v860_v48 = vor.u32 %v1036_v42, %v859_v41 }
  0x18   :  { %506 = vmatpush.bf16.msra.mxu1 %v916_v28  ;;  %v1006_v47 = vld [vmem:[#allocation2 + $0x10] sm:$0xff]  ;;  %v864_v49 = vor.u32 %v1033_v43, %v861_v44  ;;  %v868_v50 = vor.u32 %v1037_v46, %v867_v45  ;;  %v1029_v52 = vld [vmem:[#allocation4 + $0x88] sm:$0xf0]  ;;  %v839_v55 = vld [vmem:[#allocation4 + $0x78] sm:$0xf] }
  0x19   :  { %124 = vmatpush.bf16.msra.mxu0 %v1008_v27  ;;  %v831_v51 = vld [vmem:[#allocation4 + $0x70] sm:$0xf]  ;;  %v1026_v53 = vld [vmem:[#allocation4 + $0x74] sm:$0xf]  ;;  %v1005_v57 = vld [vmem:[#allocation2 + $0x8] sm:$0xff] }
  0x1a   :  { %519 = vmatpush.bf16.msra.mxu2 %v920_v29  ;;  %532 = vmatpush.bf16.msra.mxu3 %v924_v30  ;;  %v833_v54 = vld [vmem:[#allocation4 + $0x8c] sm:$0xf0]  ;;  %v1030_v56 = vld [vmem:[#allocation4 + $0x90] sm:$0xf0]  ;;  %v832_v58 = vor.u32 %v1029_v52, %v831_v51  ;;  %v803_v62 = vld [vmem:[#allocation4 + $0x38] sm:$0xf] }
  0x1b   :  { %v1062_v59 = vld [vmem:[#allocation4 + $0x194] sm:$0xf]  ;;  %v836_v60 = vor.u32 %v1026_v53, %v833_v54  ;;  %v840_v61 = vor.u32 %v1030_v56, %v839_v55  ;;  %v981_v0 = vld [vmem:[#allocation4 + $0x1ac] sm:$0xf0]  ;;  %v1019_v1 = vld [vmem:[#allocation4 + $0x3c] sm:$0xf] }
  0x1c   :  { %507 = vmatpush.bf16.msra.mxu1 %v888_v38  ;;  %v1022_v63 = vld [vmem:[#allocation4 + $0x50] sm:$0xf0]  ;;  %v805_v2 = vld [vmem:[#allocation4 + $0x54] sm:$0xf0]  ;;  %v1004_v3 = vld [vmem:[#allocation2] sm:$0xff]  ;;  %v984_v10 = vor.u32 %v1062_v59, %v981_v0 }
  0x1d   :  { %125 = vmatpush.bf16.msra.mxu0 %v1007_v37  ;;  %v811_v4 = vld [vmem:[#allocation4 + $0x40] sm:$0xf]  ;;  %v1023_v5 = vld [vmem:[#allocation4 + $0x58] sm:$0xf0]  ;;  %v953_v7 = vld [vmem:[#allocation4 + $0x174] sm:$0xf0]  ;;  %v804_v8 = vor.u32 %v1022_v63, %v803_v62  ;;  %v808_v11 = vor.u32 %v1019_v1, %v805_v2 }
  0x1e   :  { %520 = vmatpush.bf16.msra.mxu2 %v892_v39  ;;  %533 = vmatpush.bf16.msra.mxu3 %v896_v40  ;;  %v1055_v6 = vld [vmem:[#allocation4 + $0x15c] sm:$0xf]  ;;  %v775_v9 = vld [vmem:[#allocation4] sm:$0xf]  ;;  %v1012_v13 = vld [vmem:[#allocation4 + $0x4] sm:$0xf]  ;;  %v812_v15 = vor.u32 %v1023_v5, %v811_v4 }
  0x1f   :  { %v1015_v12 = vld [vmem:[#allocation4 + $0x18] sm:$0xf0]  ;;  %v52_v14 = vld [vmem:[%s1256_s0] sm:$0xf]  ;;  %v783_v17 = vld [vmem:[#allocation4 + $0x8] sm:$0xf]  ;;  %v956_v26 = vor.u32 %v1055_v6, %v953_v7 }
  0x20   :  { %508 = vmatpush.bf16.msra.mxu1 %v860_v48  ;;  %v777_v16 = vld [vmem:[#allocation4 + $0x1c] sm:$0xf0]  ;;  %v1016_v18 = vld [vmem:[#allocation4 + $0x20] sm:$0xf0]  ;;  %v987_v19 = vld [vmem:[#allocation4 + $0x198] sm:$0xf]  ;;  %v776_v22 = vor.u32 %v1015_v12, %v775_v9 }
  0x21   :  { %126 = vmatpush.bf16.msra.mxu0 %v1006_v47  ;;  %v1066_v20 = vld [vmem:[#allocation4 + $0x1b0] sm:$0xf0]  ;;  %v1063_v21 = vld [vmem:[#allocation4 + $0x19c] sm:$0xf]  ;;  %v989_v23 = vld [vmem:[#allocation4 + $0x1b4] sm:$0xf0]  ;;  %v780_v27 = vor.u32 %v1012_v13, %v777_v16  ;;  %v784_v30 = vor.u32 %v1016_v18, %v783_v17 }
  0x22   :  { %521 = vmatpush.bf16.msra.mxu2 %v864_v49  ;;  %534 = vmatpush.bf16.msra.mxu3 %v868_v50  ;;  %v995_v24 = vld [vmem:[#allocation4 + $0x1a0] sm:$0xf]  ;;  %v1067_v25 = vld [vmem:[#allocation4 + $0x1b8] sm:$0xf0]  ;;  %v1048_v28 = vld [vmem:[#allocation4 + $0x124] sm:$0xf]  ;;  %v988_v31 = vor.u32 %v1066_v20, %v987_v19  ;;  %v992_v32 = vor.u32 %v1063_v21, %v989_v23 }
  0x23   :  { %v925_v29 = vld [vmem:[#allocation4 + $0x13c] sm:$0xf0]  ;;  %v996_v33 = vor.u32 %v1067_v25, %v995_v24  ;;  %v1059_v35 = vld [vmem:[#allocation4 + $0x178] sm:$0xf0]  ;;  %v1056_v36 = vld [vmem:[#allocation4 + $0x164] sm:$0xf] }
  0x24   :  { %509 = vmatpush.bf16.msra.mxu1 %v832_v58  ;;  %v959_v34 = vld [vmem:[#allocation4 + $0x160] sm:$0xf]  ;;  %v967_v38 = vld [vmem:[#allocation4 + $0x168] sm:$0xf]  ;;  %v1060_v39 = vld [vmem:[#allocation4 + $0x180] sm:$0xf0]  ;;  %v928_v40 = vor.u32 %v1048_v28, %v925_v29 }
  0x25   :  { %127 = vmatpush.bf16.msra.mxu0 %v1005_v57  ;;  %v961_v37 = vld [vmem:[#allocation4 + $0x17c] sm:$0xf0]  ;;  %v1041_v41 = vld [vmem:[#allocation4 + $0xec] sm:$0xf]  ;;  %v897_v42 = vld [vmem:[#allocation4 + $0x104] sm:$0xf0]  ;;  %v960_v43 = vor.u32 %v1059_v35, %v959_v34  ;;  %v968_v45 = vor.u32 %v1060_v39, %v967_v38 }
  0x26   :  { %522 = vmatpush.bf16.msra.mxu2 %v836_v60  ;;  %535 = vmatpush.bf16.msra.mxu3 %v840_v61  ;;  %v964_v44 = vor.u32 %v1056_v36, %v961_v37  ;;  %v900_v46 = vor.u32 %v1041_v41, %v897_v42  ;;  %v1034_v47 = vld [vmem:[#allocation4 + $0xb4] sm:$0xf]  ;;  %v869_v48 = vld [vmem:[#allocation4 + $0xcc] sm:$0xf0]  ;;  %v1027_v50 = vld [vmem:[#allocation4 + $0x7c] sm:$0xf] }
  0x27   :  { %v872_v49 = vor.u32 %v1034_v47, %v869_v48  ;;  %v841_v51 = vld [vmem:[#allocation4 + $0x94] sm:$0xf0]  ;;  %v1020_v53 = vld [vmem:[#allocation4 + $0x44] sm:$0xf]  ;;  %v813_v54 = vld [vmem:[#allocation4 + $0x5c] sm:$0xf0] }
  0x28   :  { %510 = vmatpush.bf16.msra.mxu1 %v804_v8  ;;  %v844_v52 = vor.u32 %v1027_v50, %v841_v51  ;;  %v931_v55 = vld [vmem:[#allocation4 + $0x128] sm:$0xf]  ;;  %v816_v56 = vor.u32 %v1020_v53, %v813_v54  ;;  %v1052_v57 = vld [vmem:[#allocation4 + $0x140] sm:$0xf0]  ;;  %v1049_v58 = vld [vmem:[#allocation4 + $0x12c] sm:$0xf] }
  0x29   :  { %128 = vmatpush.bf16.msra.mxu0 %v1004_v3  ;;  %v933_v59 = vld [vmem:[#allocation4 + $0x144] sm:$0xf0]  ;;  %v932_v60 = vor.u32 %v1052_v57, %v931_v55  ;;  %v939_v62 = vld [vmem:[#allocation4 + $0x130] sm:$0xf]  ;;  %v1053_v63 = vld [vmem:[#allocation4 + $0x148] sm:$0xf0] }
  0x2a   :  { %523 = vmatpush.bf16.msra.mxu2 %v808_v11  ;;  %536 = vmatpush.bf16.msra.mxu3 %v812_v15  ;;  %v936_v61 = vor.u32 %v1049_v58, %v933_v59  ;;  %v940_v0 = vor.u32 %v1053_v63, %v939_v62  ;;  %v1013_v1 = vld [vmem:[#allocation4 + $0xc] sm:$0xf]  ;;  %v785_v2 = vld [vmem:[#allocation4 + $0x24] sm:$0xf0]  ;;  %v903_v3 = vld [vmem:[#allocation4 + $0xf0] sm:$0xf] }
  0x2b   :  { %v788_v4 = vor.u32 %v1013_v1, %v785_v2  ;;  %v1045_v5 = vld [vmem:[#allocation4 + $0x108] sm:$0xf0]  ;;  %v1042_v6 = vld [vmem:[#allocation4 + $0xf4] sm:$0xf]  ;;  %v905_v7 = vld [vmem:[#allocation4 + $0x10c] sm:$0xf0] }
  0x2c   :  { %129 = vmatmul.bf16.vlgmr.msra.gmra.mxu0 %v52_v14  ;;  %511 = vmatpush.bf16.msra.mxu1 %v776_v22  ;;  %v904_v8 = vor.u32 %v1045_v5, %v903_v3  ;;  %v908_v9 = vor.u32 %v1042_v6, %v905_v7  ;;  %v1046_v11 = vld [vmem:[#allocation4 + $0x110] sm:$0xf0]  ;;  %v875_v13 = vld [vmem:[#allocation4 + $0xb8] sm:$0xf]  ;;  %v1035_v15 = vld [vmem:[#allocation4 + $0xbc] sm:$0xf] }
  0x2d   :  { %543 = vmatpush.bf16.msrb.mxu0 %v984_v10  ;;  %v911_v10 = vld [vmem:[#allocation4 + $0xf8] sm:$0xf]  ;;  %v1038_v14 = vld [vmem:[#allocation4 + $0xd0] sm:$0xf0]  ;;  %v883_v18 = vld [vmem:[#allocation4 + $0xc0] sm:$0xf] }
  0x2e   :  { %524 = vmatpush.bf16.msra.mxu2 %v780_v27  ;;  %537 = vmatpush.bf16.msra.mxu3 %v784_v30  ;;  %v912_v12 = vor.u32 %v1046_v11, %v911_v10  ;;  %v876_v16 = vor.u32 %v1038_v14, %v875_v13  ;;  %v877_v17 = vld [vmem:[#allocation4 + $0xd4] sm:$0xf0]  ;;  %v1039_v19 = vld [vmem:[#allocation4 + $0xd8] sm:$0xf0]  ;;  %v847_v22 = vld [vmem:[#allocation4 + $0x80] sm:$0xf] }
  0x2f   :  { %v880_v20 = vor.u32 %v1035_v15, %v877_v17  ;;  %v884_v21 = vor.u32 %v1039_v19, %v883_v18  ;;  %v1031_v23 = vld [vmem:[#allocation4 + $0x98] sm:$0xf0]  ;;  %v1028_v24 = vld [vmem:[#allocation4 + $0x84] sm:$0xf]  ;;  %v855_v27 = vld [vmem:[#allocation4 + $0x88] sm:$0xf] }
  0x30   :  { %556 = vmatpush.bf16.msrb.mxu1 %v988_v31  ;;  %v848_v25 = vor.u32 %v1031_v23, %v847_v22  ;;  %v1032_v28 = vld [vmem:[#allocation4 + $0xa0] sm:$0xf0]  ;;  %v819_v31 = vld [vmem:[#allocation4 + $0x48] sm:$0xf]  ;;  %v827_v35 = vld [vmem:[#allocation4 + $0x50] sm:$0xf] }
  0x31   :  { %544 = vmatpush.bf16.msrb.mxu0 %v956_v26  ;;  %v849_v26 = vld [vmem:[#allocation4 + $0x9c] sm:$0xf0]  ;;  %v856_v30 = vor.u32 %v1032_v28, %v855_v27  ;;  %v821_v34 = vld [vmem:[#allocation4 + $0x64] sm:$0xf0]  ;;  %v1025_v36 = vld [vmem:[#allocation4 + $0x68] sm:$0xf0] }
  0x32   :  { %569 = vmatpush.bf16.msrb.mxu2 %v992_v32  ;;  %582 = vmatpush.bf16.msrb.mxu3 %v996_v33  ;;  %v852_v29 = vor.u32 %v1028_v24, %v849_v26  ;;  %v1024_v32 = vld [vmem:[#allocation4 + $0x60] sm:$0xf0]  ;;  %v1021_v33 = vld [vmem:[#allocation4 + $0x4c] sm:$0xf]  ;;  %v828_v39 = vor.u32 %v1025_v36, %v827_v35  ;;  %v1014_v42 = vld [vmem:[#allocation4 + $0x14] sm:$0xf] }
  0x33   :  { %v820_v37 = vor.u32 %v1024_v32, %v819_v31  ;;  %v824_v38 = vor.u32 %v1021_v33, %v821_v34  ;;  %v1017_v41 = vld [vmem:[#allocation4 + $0x28] sm:$0xf0]  ;;  %v200_v55 = vld [vmem:[%s1260_s4] sm:$0xff] }
  0x34   :  { %557 = vmatpush.bf16.msrb.mxu1 %v960_v43  ;;  %v793_v43 = vld [vmem:[#allocation4 + $0x2c] sm:$0xf0]  ;;  %v205_v57 = vperm.slane %v200_v55, 3  ;;  %v203_v63 = vperm.slane %v200_v55, 1  ;;  %v204_v1 = vperm.slane %v200_v55, 2  ;;  %v206_v14 = vperm.slane %v200_v55, 4 }
  0x35   :  { %545 = vmatpush.bf16.msrb.mxu0 %v928_v40  ;;  %v791_v40 = vld [vmem:[#allocation4 + $0x10] sm:$0xf]  ;;  %v796_v47 = vor.u32 %v1014_v42, %v793_v43  ;;  %v208_v26 = vperm.slane %v200_v55, 6 }
  0x36   :  { %570 = vmatpush.bf16.msrb.mxu2 %v964_v44  ;;  %583 = vmatpush.bf16.msrb.mxu3 %v968_v45  ;;  %v799_v44 = vld [vmem:[#allocation4 + $0x18] sm:$0xf]  ;;  %v1018_v45 = vld [vmem:[#allocation4 + $0x30] sm:$0xf0] }
  0x37   :  { %v800_v48 = vor.u32 %v1018_v45, %v799_v44 }
  0x38   :  { %558 = vmatpush.bf16.msrb.mxu1 %v932_v60 }
  0x39   :  { %546 = vmatpush.bf16.msrb.mxu0 %v900_v46  ;;  %v792_v46 = vor.u32 %v1017_v41, %v791_v40 }
  0x3a   :  { %571 = vmatpush.bf16.msrb.mxu2 %v936_v61  ;;  %584 = vmatpush.bf16.msrb.mxu3 %v940_v0 }
  0x3c   :  { %559 = vmatpush.bf16.msrb.mxu1 %v904_v8 }
  0x3d   :  { %547 = vmatpush.bf16.msrb.mxu0 %v872_v49  ;;  %v1074_v49 = vld [vmem:[%s1258_s2] ss:$0 sm:$0xff] }
  0x3e   :  { %572 = vmatpush.bf16.msrb.mxu2 %v908_v9  ;;  %585 = vmatpush.bf16.msrb.mxu3 %v912_v12 }
  0x40   :  { %560 = vmatpush.bf16.msrb.mxu1 %v876_v16 }
  0x41   :  { %548 = vmatpush.bf16.msrb.mxu0 %v844_v52 }
  0x42   :  { %573 = vmatpush.bf16.msrb.mxu2 %v880_v20  ;;  %586 = vmatpush.bf16.msrb.mxu3 %v884_v21 }
  0x44   :  { %561 = vmatpush.bf16.msrb.mxu1 %v848_v25  ;;  %v207_v25 = vperm.slane %v200_v55, 5 }
  0x45   :  { %549 = vmatpush.bf16.msrb.mxu0 %v816_v56  ;;  %v202_v56 = vperm.slane %v200_v55, 0 }
  0x46   :  { %574 = vmatpush.bf16.msrb.mxu2 %v852_v29  ;;  %587 = vmatpush.bf16.msrb.mxu3 %v856_v30 }
  0x48   :  { %562 = vmatpush.bf16.msrb.mxu1 %v820_v37 }
  0x49   :  { %550 = vmatpush.bf16.msrb.mxu0 %v788_v4 }
  0x4a   :  { %575 = vmatpush.bf16.msrb.mxu2 %v824_v38  ;;  %588 = vmatpush.bf16.msrb.mxu3 %v828_v39 }
  0x4c   :  { %563 = vmatpush.bf16.msrb.mxu1 %v792_v46 }
  0x4e   :  { %576 = vmatpush.bf16.msrb.mxu2 %v796_v47  ;;  %589 = vmatpush.bf16.msrb.mxu3 %v800_v48 }
  0xa9   :  { %v130_v50 = vpop.f32.mrf.mxu0 }
  0xaa   :  { %v131_v51 = vadd.f32 %v1074_v49, %v130_v50 }
  0xac   :  { %v134_v52 = vmax.f32 %v131_v51, 0.0 }
  0xae   :  { %v135_v53 = vpack.c.bf16 %v134_v52, %v134_v52 }
  0xb0   :  { %512 = vmatmul.bf16.vlgmr.msra.gmra.mxu1 %v135_v53  ;;  %525 = vmatmul.bf16.vlgmr.msra.gmra.mxu2 %v135_v53 }
  0xb1   :  { %538 = vmatmul.bf16.vlgmr.msra.gmra.mxu3 %v135_v53  ;;  %551 = vmatmul.bf16.vlgmr.msrb.gmra.mxu0 %v135_v53  ;;  %v132_v54 = vpop.f32.mrf.mxu0 }
  0xc0   :  { %564 = vmatmul.bf16.vlgmr.msrb.gmra.mxu1 %v135_v53  ;;  %577 = vmatmul.bf16.vlgmr.msrb.gmra.mxu2 %v135_v53 }
  0xc1   :  { %590 = vmatmul.bf16.vlgmr.msrb.gmra.mxu3 %v135_v53 }
 0x12d   :  { %v513_v58 = vpop.f32.mrf.mxu1 }
 0x12e   :  { %v514_v59 = vadd.f32 %v513_v58, %v202_v56  ;;  %v552_v60 = vpop.f32.mrf.mxu0 }
 0x12f   :  { %v553_v61 = vadd.f32 %v552_v60, %v205_v57 }
 0x130   :  { %v997_v62 = vmul.f32 -1.442695, %v514_v59 }
 0x131   :  { %v1000_v0 = vmul.f32 -1.442695, %v553_v61 }
 0x132   :  { %1075 = vpow2.f32 %v997_v62 }
 0x133   :  { %1077 = vpow2.f32 %v1000_v0  ;;  %v526_v2 = vpop.f32.mrf.mxu2 }
 0x134   :  { %v527_v3 = vadd.f32 %v526_v2, %v203_v63  ;;  %v539_v4 = vpop.f32.mrf.mxu3 }
 0x135   :  { %v540_v5 = vadd.f32 %v539_v4, %v204_v1  ;;  %v515_v6 = vpop.f32.mrf.mxu1 }
 0x136   :  { %v998_v7 = vmul.f32 -1.442695, %v527_v3  ;;  %v554_v8 = vpop.f32.mrf.mxu0 }
 0x137   :  { %v999_v9 = vmul.f32 -1.442695, %v540_v5 }
 0x138   :  { %v1076_v10 = vpop.eup %1075  ;;  %1079 = vpow2.f32 %v998_v7 }
 0x139   :  { %v1078_v11 = vpop.eup %1077  ;;  %v616_v12 = vadd.f32 1.0, %v1076_v10  ;;  %1081 = vpow2.f32 %v999_v9 }
 0x13a   :  { %v619_v13 = vadd.f32 1.0, %v1078_v11 }
 0x13b   :  { %1083 = vrcp.f32 %v616_v12  ;;  %v528_v15 = vpop.f32.mrf.mxu2  ;;  %v632_v29 = vand.u32 2147483647, %v616_v12  ;;  %v634_v30 = vand.u32 2147483648, %v616_v12  ;;  %vm628_vm0 = vweird.f32 %v616_v12 }
 0x13c   :  { %1085 = vrcp.f32 %v619_v13  ;;  %v541_v16 = vpop.f32.mrf.mxu3  ;;  %v677_v34 = vand.u32 2147483647, %v619_v13  ;;  %v679_v35 = vand.u32 2147483648, %v619_v13  ;;  %vm673_vm1 = vweird.f32 %v619_v13 }
 0x13d   :  { %v565_v17 = vpop.f32.mrf.mxu1  ;;  %vm1212_vm3 = vcmp.eq.f32.partialorder %v632_v29, 8.507059e+37  ;;  %v635_v43 = vor.u32 1.1754944e-38, %v634_v30 }
 0x13e   :  { %v1080_v18 = vpop.eup %1079  ;;  %v566_v19 = vadd.f32 %v565_v17, %v206_v14  ;;  %vm1216_vm5 = vcmp.eq.f32.partialorder %v677_v34, 8.507059e+37  ;;  %v680_v51 = vor.u32 1.1754944e-38, %v679_v35 }
 0x13f   :  { %v1082_v20 = vpop.eup %1081  ;;  %v1206_v21 = vadd.f32 1.0, %v1080_v18 }
 0x140   :  { %v1208_v22 = vadd.f32 1.0, %v1082_v20  ;;  %v1001_v23 = vmul.f32 -1.442695, %v566_v19 }
 0x141   :  { %v1084_v24 = vpop.eup %1083  ;;  %1087 = vrcp.f32 %v1206_v21  ;;  %v647_v54 = vand.u32 2147483647, %v1206_v21  ;;  %v649_v59 = vand.u32 2147483648, %v1206_v21  ;;  %vm643_vm10 = vweird.f32 %v1206_v21 }
 0x142   :  { %v1086_v27 = vpop.eup %1085  ;;  %v624_v28 = vmul.f32 %v1084_v24, %v616_v12  ;;  %1089 = vrcp.f32 %v1208_v22  ;;  %vm629_vm2 = vweird.f32 %v1084_v24  ;;  %v664_v3 = vand.u32 2147483648, %v1208_v22 }
 0x143   :  { %v669_v31 = vmul.f32 %v1086_v27, %v619_v13  ;;  %v578_v32 = vpop.f32.mrf.mxu2  ;;  %1091 = vpow2.f32 %v1001_v23  ;;  %vm674_vm4 = vweird.f32 %v1086_v27  ;;  %vm630_vm6 = vmor %vm628_vm0, %vm629_vm2  ;;  %v662_v6 = vand.u32 2147483647, %v1208_v22 }
 0x144   :  { %v625_v33 = vsub.f32 1.0, %v624_v28  ;;  %v591_v36 = vpop.f32.mrf.mxu3  ;;  %v579_v38 = vadd.f32 %v578_v32, %v207_v25  ;;  %vm675_vm7 = vmor %vm673_vm1, %vm674_vm4  ;;  %v650_v9 = vor.u32 1.1754944e-38, %v649_v59  ;;  %vm658_vm12 = vweird.f32 %v1208_v22 }
 0x145   :  { %v670_v37 = vsub.f32 1.0, %v669_v31  ;;  %v592_v39 = vadd.f32 %v591_v36, %v208_v26  ;;  %v567_v40 = vpop.f32.mrf.mxu1  ;;  %vm648_vm13 = vcmp.eq.f32.partialorder %v647_v54, 8.507059e+37  ;;  %v665_v13 = vor.u32 1.1754944e-38, %v664_v3 }
 0x146   :  { %v626_v41 = vmul.f32 %v1084_v24, %v625_v33  ;;  %v1002_v46 = vmul.f32 -1.442695, %v579_v38  ;;  %vm663_vm15 = vcmp.eq.f32.partialorder %v662_v6, 8.507059e+37 }
 0x147   :  { %v1088_v44 = vpop.eup %1087  ;;  %v671_v45 = vmul.f32 %v1086_v27, %v670_v37  ;;  %v1003_v47 = vmul.f32 -1.442695, %v592_v39 }
 0x148   :  { %v1090_v48 = vpop.eup %1089  ;;  %v627_v49 = vadd.f32 %v1084_v24, %v626_v41  ;;  %v639_v52 = vmul.f32 %v1088_v44, %v1206_v21  ;;  %1093 = vpow2.f32 %v1002_v46  ;;  %vm644_vm8 = vweird.f32 %v1088_v44 }
 0x149   :  { %v672_v53 = vadd.f32 %v1086_v27, %v671_v45  ;;  %v654_v55 = vmul.f32 %v1090_v48, %v1208_v22  ;;  %v1092_v56 = vpop.eup %1091  ;;  %1095 = vpow2.f32 %v1003_v47  ;;  %vm659_vm9 = vweird.f32 %v1090_v48  ;;  %vm645_vm11 = vmor %vm643_vm10, %vm644_vm8 }
 0x14a   :  { %v631_v57 = vsel %vm630_vm6, %v1084_v24, %v627_v49  ;;  %v640_v58 = vsub.f32 1.0, %v639_v52  ;;  %v620_v63 = vadd.f32 1.0, %v1092_v56  ;;  %vm660_vm14 = vmor %vm658_vm12, %vm659_vm9 }
 0x14b   :  { %v636_v60 = vsel %vm1212_vm3, %v635_v43, %v631_v57  ;;  %v676_v61 = vsel %vm675_vm7, %v1086_v27, %v672_v53  ;;  %v655_v62 = vsub.f32 1.0, %v654_v55  ;;  %v580_v0 = vpop.f32.mrf.mxu2 }
 0x14c   :  { %728 = vst [vmem:[%s1261_s5] sm:$0xff] %v636_v60  ;;  %v681_v1 = vsel %vm1216_vm5, %v680_v51, %v676_v61  ;;  %v641_v2 = vmul.f32 %v1088_v44, %v640_v58  ;;  %v593_v4 = vpop.f32.mrf.mxu3  ;;  %1097 = vrcp.f32 %v620_v63  ;;  %v692_v22 = vand.u32 2147483647, %v620_v63 }
 0x14d   :  { %731 = vst [vmem:[%s1261_s5 + $0x18] sm:$0xff] %v681_v1  ;;  %v656_v5 = vmul.f32 %v1090_v48, %v655_v62  ;;  %v694_v23 = vand.u32 2147483648, %v620_v63  ;;  %vm688_vm1 = vweird.f32 %v620_v63 }
 0x14e   :  { %v642_v7 = vadd.f32 %v1088_v44, %v641_v2  ;;  %v1094_v8 = vpop.eup %1093  ;;  %vm693_vm3 = vcmp.eq.f32.partialorder %v692_v22, 8.507059e+37 }
 0x14f   :  { %v657_v10 = vadd.f32 %v1090_v48, %v656_v5  ;;  %v1096_v11 = vpop.eup %1095  ;;  %v621_v14 = vadd.f32 1.0, %v1094_v8  ;;  %v695_v30 = vor.u32 1.1754944e-38, %v694_v23 }
 0x150   :  { %v646_v12 = vsel %vm645_vm11, %v1088_v44, %v642_v7  ;;  %v622_v17 = vadd.f32 1.0, %v1096_v11 }
 0x151   :  { %v651_v15 = vsel %vm648_vm13, %v650_v9, %v646_v12  ;;  %v661_v16 = vsel %vm660_vm14, %v1090_v48, %v657_v10  ;;  %1099 = vrcp.f32 %v621_v14  ;;  %v707_v33 = vand.u32 2147483647, %v621_v14 }
 0x152   :  { %729 = vst [vmem:[%s1261_s5 + $0x8] sm:$0xff] %v651_v15  ;;  %v666_v18 = vsel %vm663_vm15, %v665_v13, %v661_v16  ;;  %v1098_v19 = vpop.eup %1097  ;;  %1101 = vrcp.f32 %v622_v17  ;;  %v709_v34 = vand.u32 2147483648, %v621_v14  ;;  %v724_v38 = vand.u32 2147483648, %v622_v17 }
 0x153   :  { %730 = vst [vmem:[%s1261_s5 + $0x10] sm:$0xff] %v666_v18  ;;  %v684_v20 = vmul.f32 %v1098_v19, %v620_v63  ;;  %vm689_vm0 = vweird.f32 %v1098_v19  ;;  %v722_v40 = vand.u32 2147483647, %v622_v17  ;;  %vm703_vm6 = vweird.f32 %v621_v14 }
 0x154   :  { %vm690_vm2 = vmor %vm688_vm1, %vm689_vm0  ;;  %v710_v42 = vor.u32 1.1754944e-38, %v709_v34  ;;  %vm718_vm8 = vweird.f32 %v622_v17  ;;  %vm708_vm9 = vcmp.eq.f32.partialorder %v707_v33, 8.507059e+37  ;;  %v725_v45 = vor.u32 1.1754944e-38, %v724_v38 }
 0x155   :  { %v685_v21 = vsub.f32 1.0, %v684_v20  ;;  %vm723_vm11 = vcmp.eq.f32.partialorder %v722_v40, 8.507059e+37 }
 0x157   :  { %v1100_v24 = vpop.eup %1099  ;;  %v686_v25 = vmul.f32 %v1098_v19, %v685_v21 }
 0x158   :  { %v1102_v26 = vpop.eup %1101  ;;  %v699_v27 = vmul.f32 %v1100_v24, %v621_v14  ;;  %vm704_vm4 = vweird.f32 %v1100_v24 }
 0x159   :  { %v687_v28 = vadd.f32 %v1098_v19, %v686_v25  ;;  %v714_v29 = vmul.f32 %v1102_v26, %v622_v17  ;;  %vm719_vm5 = vweird.f32 %v1102_v26  ;;  %vm705_vm7 = vmor %vm703_vm6, %vm704_vm4 }
 0x15a   :  { %v700_v31 = vsub.f32 1.0, %v699_v27  ;;  %vm720_vm10 = vmor %vm718_vm8, %vm719_vm5 }
 0x15b   :  { %v691_v32 = vsel %vm690_vm2, %v1098_v19, %v687_v28  ;;  %v715_v35 = vsub.f32 1.0, %v714_v29 }
 0x15c   :  { %v696_v36 = vsel %vm693_vm3, %v695_v30, %v691_v32  ;;  %v701_v37 = vmul.f32 %v1100_v24, %v700_v31 }
 0x15d   :  { %732 = vst [vmem:[%s1261_s5 + $0x20] sm:$0xff] %v696_v36  ;;  %v716_v39 = vmul.f32 %v1102_v26, %v715_v35 }
 0x15e   :  { %v702_v41 = vadd.f32 %v1100_v24, %v701_v37 }
 0x15f   :  { %v717_v43 = vadd.f32 %v1102_v26, %v716_v39 }
 0x160   :  { %v706_v44 = vsel %vm705_vm7, %v1100_v24, %v702_v41 }
 0x161   :  { %v711_v46 = vsel %vm708_vm9, %v710_v42, %v706_v44  ;;  %v721_v47 = vsel %vm720_vm10, %v1102_v26, %v717_v43 }
 0x162   :  { %733 = vst [vmem:[%s1261_s5 + $0x28] sm:$0xff] %v711_v46  ;;  %v726_v48 = vsel %vm723_vm11, %v725_v45, %v721_v47 }
 0x163   :  { %734 = vst [vmem:[%s1261_s5 + $0x30] sm:$0xff] %v726_v48 }
 0x164   :  { %739 = vsyncpa [#allocation3], 1 }
 0x165   :  { %740 = vsyncpa [#allocation5], 1 }

</bundles_post_ra>
